<compile_context>
chip_gen: v5e
topology: v5e:2x2
jax: 0.10.0
libtpu: 0.0.40
codegen_flags: <defaults>
</compile_context>

<pallas_src>
import functools

import jax
import jax.numpy as jnp
from jax.experimental import pallas as pl
from jax.experimental.pallas import tpu as pltpu


# ----------------------------------------------------------------------------
# Small trace-time integer helpers.
# ----------------------------------------------------------------------------
_LANE = 128


def _cdiv(a: int, b: int) -> int:
    return -(-a // b)


def _round_up(a: int, m: int) -> int:
    return _cdiv(a, m) * m


# ----------------------------------------------------------------------------
# Chip-aware VMEM budgeting (queried lazily, cached).
# ----------------------------------------------------------------------------
@functools.lru_cache(maxsize=None)
def _vmem_params() -> tuple[int, int]:
    """(per-block bytes, vmem_limit_bytes) derived from the chip's VMEM size.

    v7x has 64 MiB VMEM per TensorCore; v5e/v6e have 128 MiB.  One input block
    + one output block, each double-buffered, gives 4 live VMEM buffers, so we
    target block ~= vmem/16, clamped to [2 MiB, 8 MiB]:
      * v7x  -> 4 MiB blocks (16 MiB live vs 32 MiB limit: ample headroom)
      * v6e/v5e -> 8 MiB blocks (copy roofline already saturates at ~1-4 MiB)
    """
    try:
        info = pltpu.get_tpu_info()
        vmem = int(getattr(info, "vmem_capacity_bytes", 0)) or 64 * 1024 * 1024
    except Exception:
        vmem = 64 * 1024 * 1024  # conservative fallback (v7x per-core VMEM)
    block_bytes = max(2 * 1024 * 1024, min(8 * 1024 * 1024, vmem // 16))
    vmem_limit = min(vmem // 2, 64 * 1024 * 1024)
    return block_bytes, vmem_limit


# ----------------------------------------------------------------------------
# Pallas kernel: elementwise copy (out-of-place identity / materialization).
# ----------------------------------------------------------------------------
def _copy_kernel(x_ref, o_ref):
    o_ref[...] = x_ref[...]


def _choose_tiling(n: int, dtype, block_bytes: int):
    """Return (width, rows, block_rows) for a lane-dense 2D slab, or None.

    Only sizes that reshape exactly into (rows, width) with rows a multiple of
    the dtype-aware sublane tile are accepted — no pad / slice copies ever.
    Ragged sizes return None and the caller falls back to the native path.
    """
    itemsize = jnp.dtype(dtype).itemsize
    packing = max(1, 4 // itemsize)      # f32: 1, bf16: 2, int8/fp8: 4
    sublane = 8 * packing                # dtype-aware minimum sublane tile

    width = None
    for w in (32 * _LANE, 16 * _LANE, 8 * _LANE, 4 * _LANE, 2 * _LANE, _LANE):
        if n % (w * sublane) == 0:
            width = w
            break
    if width is None:
        return None                      # ragged: no zero-copy tiling exists

    rows = n // width                    # multiple of `sublane` by construction

    # Largest block that fits the per-buffer VMEM budget (multiple of sublane).
    block_rows = max(
        sublane, (block_bytes // (width * itemsize)) // sublane * sublane
    )
    # Cap so the grid has >= ~4 steps when possible: v7x HBM (~3.2 TB/s) is
    # shared by 2 TensorCores and a grid of 1 cannot be sharded across them.
    block_rows = min(block_rows, max(sublane, _round_up(_cdiv(rows, 4), sublane)))
    block_rows = min(block_rows, rows)
    # Round down to a divisor of `rows` so the last block is full and every
    # store is an unmasked vst (matters most on v5e's single store slot).
    while block_rows > sublane and rows % block_rows != 0:
        block_rows -= sublane
    return width, rows, block_rows


def _pallas_copy_impl(x: jax.Array) -> jax.Array:
    """Out-of-place identity (materializing copy) through a Pallas TPU kernel.

    Aligned sizes take a reshape-only zero-extra-copy path; ragged sizes fall
    back to the native identity (no pad + slice double copy).
    """
    n = x.size
    if n == 0:
        return x

    block_bytes, vmem_limit = _vmem_params()
    tiling = _choose_tiling(n, x.dtype, block_bytes)
    if tiling is None:
        # TODO(synk): ragged sizes fall back to the native identity; a masked
        # in-kernel tail block could cover them without pad/slice copies.
        return x

    width, rows, block_rows = tiling
    itemsize = jnp.dtype(x.dtype).itemsize
    x2d = x.reshape(rows, width)
    grid = (_cdiv(rows, block_rows),)

    # NOTE: since this path no longer aliases input/output, an even leaner
    # variant would issue chunked HBM->HBM pltpu.make_async_copy under
    # memory_space=pl.ANY (no VMEM staging at all); the BlockSpec pipeline
    # below is kept for portability and stays HBM-bandwidth-bound.
    out2d = pl.pallas_call(
        _copy_kernel,
        out_shape=jax.ShapeDtypeStruct((rows, width), x.dtype),
        grid_spec=pltpu.PrefetchScalarGridSpec(
            num_scalar_prefetch=0,
            grid=grid,
            in_specs=[pl.BlockSpec((block_rows, width), lambda i: (i, 0))],
            out_specs=pl.BlockSpec((block_rows, width), lambda i: (i, 0)),
        ),
        compiler_params=pltpu.CompilerParams(
            dimension_semantics=("parallel",),   # shard grid across TCs (v7x)
            vmem_limit_bytes=vmem_limit,
        ),
        cost_estimate=pl.CostEstimate(
            flops=0,
            transcendentals=0,
            bytes_accessed=2 * n * itemsize,     # logical traffic, not padded
        ),
    )(x2d)

    return out2d.reshape(x.shape)


_pallas_copy = jax.jit(_pallas_copy_impl)


# ----------------------------------------------------------------------------
# CustomOp base class: registry + dispatch, mirroring the PyTorch module.
# ----------------------------------------------------------------------------
def _tpu_available() -> bool:
    try:
        return jax.devices()[0].platform == "tpu"
    except Exception:
        return False


class CustomOp:
    """Simplified CustomOp: dispatches to the accelerated (Pallas-TPU) path
    when enabled and a TPU backend is present, otherwise the native path."""

    op_registry: dict[str, type["CustomOp"]] = {}

    def __init__(self):
        self._forward_method = self.dispatch_forward()

    def __call__(self, *args, **kwargs):
        return self.forward(*args, **kwargs)

    def forward(self, *args, **kwargs):
        return self._forward_method(*args, **kwargs)

    def forward_native(self, *args, **kwargs):
        """Native (plain JAX) implementation."""
        raise NotImplementedError

    def forward_tpu(self, *args, **kwargs):
        """Accelerated (Pallas TPU kernel) implementation.

        Plays the role of `forward_cuda` in the reference module.
        """
        raise NotImplementedError

    def dispatch_forward(self):
        """Simplified dispatch: accelerated path if enabled and TPU present."""
        if self.enabled() and _tpu_available():
            return self.forward_tpu
        return self.forward_native

    @classmethod
    def enabled(cls) -> bool:
        """Simplified enable logic: enabled by default."""
        return True

    @classmethod
    def register(cls, name: str):
        def decorator(op_cls):
            assert name not in cls.op_registry, f"Duplicate op name: {name}"
            op_cls.name = name
            cls.op_registry[name] = op_cls
            return op_cls

        return decorator


# ----------------------------------------------------------------------------
# A registered concrete op exercising the dispatch + Pallas kernel.
# The base class has no compute, so the concrete op is a pure identity.
# ----------------------------------------------------------------------------
@CustomOp.register("identity_demo")
class IdentityOp(CustomOp):
    def forward_native(self, x: jax.Array) -> jax.Array:
        return x

    def forward_tpu(self, x: jax.Array, materialize: bool = False) -> jax.Array:
        # Pure identity: the optimal "accelerated" implementation is to move
        # no bytes at all (launching a copy kernel would burn 2*N bytes of
        # HBM bandwidth for nothing), so the dispatched path short-circuits.
        # `materialize=True` requests an explicit out-of-place clone through
        # the Pallas TPU copy kernel (also the template for real ops), which
        # never mutates/consumes the caller's buffer.
        if materialize:
            return _pallas_copy(x)
        return x


if __name__ == "__main__":
    key = jax.random.PRNGKey(0)
    # Small NCHW-shaped input consistent with typical op usage.
    x = jax.random.normal(key, (2, 4, 16, 16), dtype=jnp.float32)

    op = IdentityOp()

    # 1) Dispatched forward: accelerated identity short-circuits (zero traffic).
    y = jax.block_until_ready(op(x))
    assert y.shape == x.shape and y.dtype == x.dtype
    assert bool(jnp.array_equal(y, x)), "dispatched identity mismatch"

    # 2) Exercise the Pallas TPU copy kernel once (out-of-place materialization).
    z = jax.block_until_ready(op.forward_tpu(x, materialize=True))
    assert z.shape == x.shape and z.dtype == x.dtype
    assert bool(jnp.array_equal(z, x)), "Pallas copy kernel mismatch"

    # Registry bookkeeping mirrors the reference module.
    assert "identity_demo" in CustomOp.op_registry
    assert CustomOp.op_registry["identity_demo"].name == "identity_demo"

    print("KERNEL_OK")
</pallas_src>

<mosaic_0001>
module attributes {stable_mosaic.version = 11 : i64} {
  func.func @_copy_kernel(%arg0: i32, %arg1: memref<8x256xf32, #tpu.memory_space<vmem>>, %arg2: memref<8x256xf32, #tpu.memory_space<vmem>>) attributes {dimension_semantics = [#tpu.dimension_semantics<parallel>], iteration_bounds = array<i64: 1>, scalar_prefetch = 0 : i64, scratch_operands = 0 : i64, tpu.core_type = #tpu.core_type<tc>, window_params = [{transform_indices = @transform_0, window_bounds = array<i64: 8, 256>}, {transform_indices = @transform_1, window_bounds = array<i64: 8, 256>}]} {
    %c0 = arith.constant 0 : index
    %c0_0 = arith.constant 0 : index
    %0 = vector.load %arg1[%c0, %c0_0] : memref<8x256xf32, #tpu.memory_space<vmem>>, vector<8x256xf32>
    %c0_1 = arith.constant 0 : index
    %c0_2 = arith.constant 0 : index
    %1 = vector.load %arg2[%c0_1, %c0_2] : memref<8x256xf32, #tpu.memory_space<vmem>>, vector<8x256xf32>
    tpu.vector_store %arg2[%c0_1, %c0_2], %0 {strides = array<i32>} : memref<8x256xf32, #tpu.memory_space<vmem>>, vector<8x256xf32>,
    return
  }
  func.func @transform_0(%arg0: i32) -> (i32, i32) {
    %c0_i32 = arith.constant 0 : i32
    %c0_i32_0 = arith.constant 0 : i32
    return %arg0, %c0_i32 : i32, i32
  }
  func.func @transform_1(%arg0: i32) -> (i32, i32) {
    %c0_i32 = arith.constant 0 : i32
    %c0_i32_0 = arith.constant 0 : i32
    return %arg0, %c0_i32 : i32, i32
  }
}

</mosaic_0001>

<bundles_post_ra>
// kernel: _pallas_copy_impl.1
= control target key start
LH: loop header
LB: loop body
LE: loop exit
PB: predicated region body
PF: predicated region fallthrough
CT: control target
= control target key end

     0   :  { %s38_s0 = inlined_call_operand.vmem [shape: f32[8,256], index: 0, kind: input, shape index: {}]   ;;  %s39_s1 = inlined_call_operand.vmem [shape: f32[8,256], index: 1, kind: output, shape index: {}]  }
   0x1   :  { %v8_v0 = vld [vmem:[%s38_s0] sm:$0xff]  ;;  %v9_v1 = vld [vmem:[%s38_s0 + $0x8] sm:$0xff] }
   0x2   :  { %10 = vst [vmem:[%s39_s1] sm:$0xff] %v8_v0 }
   0x3   :  { %11 = vst [vmem:[%s39_s1 + $0x8] sm:$0xff] %v9_v1 }

</bundles_post_ra>
